<compile_context>
chip_gen: v5e
topology: v5e:2x2
jax: 0.10.0
libtpu: 0.0.40
codegen_flags: <defaults>
</compile_context>

<pallas_src>
import functools

import jax
import jax.numpy as jnp
import numpy as np
from jax.experimental import pallas as pl
from jax.experimental.pallas import tpu as pltpu

LANE = 128
_VMEM_BUDGET = 40 * 1024 * 1024      # working-set target; leaves headroom on v7x (64 MiB)


def _round_up(v, m):
    return ((v + m - 1) // m) * m


# ----------------------------------------------------------------------------------
# Kernel
# ----------------------------------------------------------------------------------
def jj_norm_kernel(sel_ref, code_ref, x_ref, sums_ref, aux_ref, stats_ref, *,
                   num_time, num_label, slab, mxu_dtype):
    """Streaming accumulation over (D-block, N-tile) grid + per-D-block finalize.

    sel_ref  : (8, 128)       f32  constant; row0 = e0 (lane0=1), row1 = e1 (lane1=1)
    code_ref : (1, TILE_N)    i32  group code: train -> t*L+lab in [0, TL),
                                   test -> TL, padding -> -1 (matches nothing)
    x_ref    : (TILE_N, TILE_D)    native dtype x tile (this D block)
    sums_ref : (TL+1, TILE_D) f32  resident accumulator: group SUMS over this D block
    aux_ref  : (TL+1, 128)    f32  resident accumulator: lane0 = count,
                                   lane1 = partial sum of ||x_u||^2 over this D block
    stats_ref: (8, slab)      f32  packed per-time partial stats, written at finalize
    """
    T, L = num_time, num_label
    TL = T * L
    TLP1 = TL + 1

    i = pl.program_id(1)                  # N-tile index (reduction axis, "arbitrary")
    n_steps = pl.num_programs(1)

    # ---------------- init (first N step of this D block) ---------------------------
    @pl.when(i == 0)
    def _init():
        sums_ref[...] = jnp.zeros_like(sums_ref)
        aux_ref[...] = jnp.zeros_like(aux_ref)
        stats_ref[...] = jnp.zeros_like(stats_ref)

    # ---------------- streaming accumulation ----------------------------------------
    x_raw = x_ref[...]                                   # (TILE_N, TILE_D) native dtype
    xf = x_raw.astype(jnp.float32)
    xb = x_raw.astype(mxu_dtype)                         # MXU operand (bf16 by default)
    code = code_ref[...]                                 # (1, TILE_N) i32
    tile_n = xf.shape[0]

    # One-hot scatter matrix already in (groups, rows) orientation for the MXU.
    row_id = jax.lax.broadcasted_iota(jnp.int32, (TLP1, tile_n), 0)
    onehot = (row_id == code).astype(mxu_dtype)          # (TL+1, TILE_N), exact 0/1

    # Per-row squared norm over this D block; 128-lane trailer [1, ||x||^2, 0, ...]
    # built from constant selector rows (no per-step lane iota / selects).
    rowsq = jnp.sum(xf * xf, axis=1, keepdims=True)      # (TILE_N, 1) f32
    trailer = (sel_ref[0:1, :] + rowsq * sel_ref[1:2, :]).astype(mxu_dtype)

    sums_ref[...] += jnp.dot(onehot, xb, preferred_element_type=jnp.float32)
    aux_ref[...] += jnp.dot(onehot, trailer, preferred_element_type=jnp.float32)

    # ---------------- finalize (last N step of this D block) ------------------------
    @pl.when(i == n_steps - 1)
    def _finalize():
        S = sums_ref[...]                                # (TL+1, TILE_D) partial group SUMS
        cnt = aux_ref[:, 0:1]                            # (TL+1, 1) counts (exact)
        ssq = aux_ref[:, 1:2]                            # (TL+1, 1) partial sum ||x_u||^2

        m2 = jnp.sum(S * S, axis=1, keepdims=True)       # (TL+1, 1) partial ||group sum||^2
        # sum_u ||x_u - m||^2 = sum_u ||x_u||^2 + (cnt - 2) * ||m||^2  (m = SUM);
        # clamp at 0: exact cancellation for cnt==1 groups can go slightly negative.
        raw = jnp.maximum(ssq + (cnt - 2.0) * m2, 0.0)
        msq_g = cnt * m2                                 # train_time_mean == 0 quirk

        test_cnt = cnt[TL:TL + 1, :]                     # (1, 1)
        test_raw = raw[TL:TL + 1, :]                     # (1, 1) un-normalized test var

        # Fold (time, label) groups onto time lanes: G[g, t] = (g // L == t).
        g_idx = jax.lax.broadcasted_iota(jnp.int32, (TL, slab), 0)
        t_idx = jax.lax.broadcasted_iota(jnp.int32, (TL, slab), 1)
        G = ((g_idx >= t_idx * L) & (g_idx < (t_idx + 1) * L)).astype(jnp.float32)

        ttcnt = jnp.sum(G * cnt[:TL, :], axis=0, keepdims=True)      # (1, slab)
        rsq_raw = jnp.sum(G * raw[:TL, :], axis=0, keepdims=True)    # (1, slab) partial
        msq_raw = jnp.sum(G * msq_g[:TL, :], axis=0, keepdims=True)  # (1, slab) partial

        lane = jax.lax.broadcasted_iota(jnp.int32, (1, slab), 1)
        scal = jnp.where(lane == 0, test_cnt,
                         jnp.where(lane == 1, test_raw, 0.0))

        stats_ref[...] = jnp.concatenate(
            [ttcnt, rsq_raw, msq_raw, scal,
             jnp.zeros((4, slab), jnp.float32)], axis=0)


# ----------------------------------------------------------------------------------
# Tile planning (VMEM-budget driven)
# ----------------------------------------------------------------------------------
def _vmem_estimate(tile_n, tile_d, TLP1, slab, x_itemsize, mxu_itemsize):
    est = 0
    est += 2 * tile_n * tile_d * x_itemsize          # x tile (double-buffered)
    est += 2 * tile_n * 4                            # code tile
    est += 8 * LANE * 4                              # selector constant
    est += 2 * TLP1 * tile_d * 4                     # sums accumulator (+writeback buf)
    est += 2 * TLP1 * LANE * 4                       # aux accumulator
    est += 2 * 8 * slab * 4                          # stats slab
    est += TLP1 * tile_n * mxu_itemsize              # one-hot temp
    est += tile_n * tile_d * (4 + mxu_itemsize)      # f32 / mxu-dtype casts of the tile
    est += tile_n * LANE * (4 + mxu_itemsize)        # trailer temp
    return est


def _plan(N, D, TLP1, slab, x_itemsize, mxu_itemsize, tile_n=None, max_tile_d=None):
    Dp_aligned = _round_up(D, LANE)
    acc_full_bytes = TLP1 * (Dp_aligned + LANE) * 4

    # ---- D tiling: one block for small/moderate D; otherwise multiple-of-128 blocks
    #      (fits the resident accumulator in VMEM and engages v7x's second TensorCore
    #      via the leading "parallel" grid axis).
    if max_tile_d is not None:
        td = max(LANE, (min(max_tile_d, Dp_aligned) // LANE) * LANE)
        Dp = _round_up(D, td)
        nd = Dp // td
    elif Dp_aligned <= LANE or (acc_full_bytes <= _VMEM_BUDGET // 3 and Dp_aligned <= 512):
        td, Dp, nd = D, D, 1
    else:
        Dp = Dp_aligned
        per_blk = (_VMEM_BUDGET // 3) // (TLP1 * 4) - LANE
        per_blk = max(LANE, (per_blk // LANE) * LANE)
        upper = max(LANE, min(Dp // 2, per_blk))
        td = LANE
        for cand in range((upper // LANE) * LANE, LANE - 1, -LANE):
            if Dp % cand == 0:
                td = cand
                break
        nd = Dp // td

    # ---- N tiling: target ~2 MiB of x per step, cap the one-hot temp, don't over-pad.
    if tile_n is None:
        tgt = (2 << 20) // max(1, td * x_itemsize)
        cap_oh = (8 << 20) // max(1, TLP1 * mxu_itemsize)
        tn = min(2048, max(256, tgt), max(256, cap_oh), _round_up(max(N, 1), LANE))
        tn = max(LANE, (tn // LANE) * LANE)
        while tn > 256 and _vmem_estimate(tn, td, TLP1, slab,
                                          x_itemsize, mxu_itemsize) > _VMEM_BUDGET:
            tn -= LANE
    else:
        assert tile_n % LANE == 0 and tile_n > 0, "tile_n must be a positive multiple of 128"
        tn = tile_n

    est = _vmem_estimate(tn, td, TLP1, slab, x_itemsize, mxu_itemsize)
    vmem_limit = int(min(56 << 20, max(32 << 20, est + (12 << 20))))
    return tn, td, Dp, nd, vmem_limit


# ----------------------------------------------------------------------------------
# Wrapper
# ----------------------------------------------------------------------------------
def jj_norm_forward(x, times, labels, *, num_time, num_label, split,
                    tile_n=None, max_tile_d=None, mxu_dtype=jnp.bfloat16):
    """Runs the JJ_Norm forward statistics as one tiled, pipelined Pallas kernel."""
    x_in = jnp.asarray(x)
    x = x_in
    supported = (np.dtype(jnp.float32), np.dtype(jnp.bfloat16), np.dtype(jnp.float16))
    if x.dtype not in supported:
        x = x.astype(jnp.float32)

    N, D = x.shape
    T, L = num_time, num_label
    TL = T * L
    TLP1 = TL + 1
    slab = _round_up(max(T, 2), LANE)

    x_itemsize = x.dtype.itemsize
    mxu_itemsize = np.dtype(mxu_dtype).itemsize
    tn, td, Dp, nd, vmem_limit = _plan(N, D, TLP1, slab, x_itemsize, mxu_itemsize,
                                       tile_n=tile_n, max_tile_d=max_tile_d)
    n_pad = _round_up(max(N, 1), tn)

    times_i = jnp.asarray(times, jnp.int32).reshape(N)
    labels_i = jnp.asarray(labels, jnp.int32).reshape(N)
    # Group code: train -> time*L+label, test -> TL, padding rows -> -1 (no match).
    code = jnp.where(times_i < split, times_i * L + labels_i, TL).astype(jnp.int32)

    xp = x
    if n_pad != N or Dp != D:
        # Only copies when padding is actually required (no unconditional upcast copy).
        xp = jnp.pad(x, ((0, n_pad - N), (0, Dp - D)))
    if n_pad != N:
        code = jnp.pad(code, (0, n_pad - N), constant_values=-1)
    code2 = code.reshape(1, n_pad)
    sel = jnp.zeros((8, LANE), jnp.float32).at[0, 0].set(1.0).at[1, 1].set(1.0)

    grid = (nd, n_pad // tn)
    kernel = functools.partial(jj_norm_kernel, num_time=T, num_label=L,
                               slab=slab, mxu_dtype=mxu_dtype)

    flops = 2 * TLP1 * n_pad * (Dp + LANE * nd)
    bytes_acc = (n_pad * Dp * x_itemsize + nd * n_pad * 4
                 + TLP1 * (Dp + LANE * nd) * 4 + 8 * nd * slab * 4)

    sums, aux, stats = pl.pallas_call(
        kernel,
        out_shape=(
            jax.ShapeDtypeStruct((TLP1, Dp), jnp.float32),        # group sums (+ test row)
            jax.ShapeDtypeStruct((TLP1, nd * LANE), jnp.float32),  # per-D-block counts/sumsq
            jax.ShapeDtypeStruct((8, nd * slab), jnp.float32),     # per-D-block packed stats
        ),
        grid=grid,
        in_specs=[
            pl.BlockSpec((8, LANE), lambda jd, i: (0, 0)),         # selector constants
            pl.BlockSpec((1, tn), lambda jd, i: (0, i)),           # group code (lane-major)
            pl.BlockSpec((tn, td), lambda jd, i: (i, jd)),         # x tile (this D block)
        ],
        out_specs=(
            pl.BlockSpec((TLP1, td), lambda jd, i: (0, jd)),       # resident accumulator
            pl.BlockSpec((TLP1, LANE), lambda jd, i: (0, jd)),     # resident accumulator
            pl.BlockSpec((8, slab), lambda jd, i: (0, jd)),        # written at finalize
        ),
        compiler_params=pltpu.CompilerParams(
            dimension_semantics=("parallel", "arbitrary"),         # D blocks || , N reduction
            vmem_limit_bytes=vmem_limit),
        cost_estimate=pl.CostEstimate(flops=int(flops), transcendentals=0,
                                      bytes_accessed=int(bytes_acc)),
    )(sel, code2, xp)

    # ---------------- tiny wrapper-side combine (T-length vectors) ---------------------
    sumsD = sums[:, :D]
    train_mean = sumsD[:TL].reshape(T, L, D)
    test_mean = sumsD[TL]
    cnt_g = aux[:, 0]                                   # counts identical in every D block
    train_cnt = cnt_g[:TL].reshape(T, L)

    st = stats.reshape(8, nd, slab)
    train_time_cnt = st[0, 0, :T]
    rsq_raw = jnp.sum(st[1, :, :T], axis=0)             # sum partials over D blocks
    msq_raw = jnp.sum(st[2, :, :T], axis=0)
    test_cnt = st[3, 0, 0]
    test_raw = jnp.sum(st[3, :, 1], axis=0)

    denom_t = jnp.maximum(1.0, train_time_cnt - 1.0)
    rsq = rsq_raw / denom_t
    msq = msq_raw / denom_t
    test_var = test_raw / jnp.maximum(1.0, test_cnt - 1.0)
    alpha_sq = (test_var - msq) / jnp.maximum(1e-6, rsq)
    alpha = jnp.where(alpha_sq > 0.0, jnp.sqrt(jnp.maximum(alpha_sq, 0.0)), 0.0)

    return {
        "clone_x": x_in,                                       # module's actual return value
        "train_mean": train_mean,                              # sums (reference never divides)
        "train_cnt": train_cnt,
        "train_time_mean": jnp.zeros((T, D), jnp.float32),     # never accumulated (quirk)
        "train_time_cnt": train_time_cnt,
        "test_cnt": test_cnt,
        "test_mean": test_mean,                                # sum (reference never divides)
        "test_var": test_var,
        "rsq": rsq,
        "msq": msq,
        "alpha": alpha,
    }


# ----------------------------------------------------------------------------------
# Validation
# ----------------------------------------------------------------------------------
def _numpy_reference(x, times, labels, T, L, split):
    """Loop-for-loop transcription of the PyTorch forward (for validation)."""
    x = np.asarray(x, np.float64)
    times = np.asarray(times)
    labels = np.asarray(labels)
    N, D = x.shape
    train_mean = np.zeros((T, L, D), np.float64)
    train_cnt = np.zeros((T, L), np.float64)
    train_time_mean = np.zeros((T, D), np.float64)
    train_time_cnt = np.zeros(T, np.float64)
    test_cnt = 0.0
    test_mean = np.zeros(D, np.float64)
    for u in range(N):
        t = int(times[u])
        if t >= split:
            test_cnt += 1.0
            test_mean += x[u]
        else:
            train_time_cnt[t] += 1.0
            train_cnt[t, int(labels[u])] += 1.0
            train_mean[t, int(labels[u])] += x[u]
    test_var = 0.0
    rsq = np.zeros(T, np.float64)
    msq = np.zeros(T, np.float64)
    for u in range(N):
        t = int(times[u])
        if t >= split:
            test_var += float(np.sum((x[u] - test_mean) ** 2))
        else:
            msq[t] += float(np.sum((train_mean[t, int(labels[u])] - train_time_mean[t]) ** 2))
            rsq[t] += float(np.sum((x[u] - train_mean[t, int(labels[u])]) ** 2))
    test_var /= max(1.0, test_cnt - 1.0)
    alpha = np.zeros(T, np.float64)
    for t in range(T):
        d = max(1.0, train_time_cnt[t] - 1.0)
        msq[t] /= d
        rsq[t] /= d
        a2 = (test_var - msq[t]) / max(1e-6, rsq[t])
        alpha[t] = np.sqrt(a2) if a2 > 0 else 0.0
    return dict(train_mean=train_mean, train_cnt=train_cnt,
                train_time_cnt=train_time_cnt, test_cnt=test_cnt,
                test_mean=test_mean, test_var=test_var,
                rsq=rsq, msq=msq, alpha=alpha)


def _check(out, ref, x, rtol, atol):
    np.testing.assert_allclose(np.asarray(out["train_mean"]), ref["train_mean"],
                               rtol=rtol, atol=atol)
    np.testing.assert_allclose(np.asarray(out["train_cnt"]), ref["train_cnt"],
                               rtol=0, atol=1e-5)
    np.testing.assert_allclose(np.asarray(out["train_time_cnt"]), ref["train_time_cnt"],
                               rtol=0, atol=1e-5)
    np.testing.assert_allclose(float(out["test_cnt"]), ref["test_cnt"], rtol=0, atol=1e-5)
    np.testing.assert_allclose(np.asarray(out["test_mean"]), ref["test_mean"],
                               rtol=rtol, atol=atol)
    np.testing.assert_allclose(float(out["test_var"]), ref["test_var"], rtol=rtol, atol=atol)
    np.testing.assert_allclose(np.asarray(out["rsq"]), ref["rsq"], rtol=rtol, atol=atol)
    np.testing.assert_allclose(np.asarray(out["msq"]), ref["msq"], rtol=rtol, atol=atol)
    np.testing.assert_allclose(np.asarray(out["alpha"]), ref["alpha"], rtol=rtol, atol=atol)
    np.testing.assert_array_equal(np.asarray(out["clone_x"]), np.asarray(x))
    assert float(np.max(np.abs(np.asarray(out["train_time_mean"])))) == 0.0


if __name__ == "__main__":
    key = jax.random.PRNGKey(0)
    k1x, k1t, k1l, k2x, k2t, k2l = jax.random.split(key, 6)

    # ---- Test 1: small D (<128), bf16 MXU path, multi-step N accumulation (tile_n=128),
    #      N not a multiple of the tile to exercise tail padding/masking.
    N, D = 250, 32
    num_time, num_label, split = 8, 4, 5
    x = jax.random.normal(k1x, (N, D), dtype=jnp.float32)
    times = jax.random.randint(k1t, (N,), 0, num_time, dtype=jnp.int32)
    labels = jax.random.randint(k1l, (N,), 0, num_label, dtype=jnp.int32)

    out = jj_norm_forward(x, times, labels, num_time=num_time, num_label=num_label,
                          split=split, tile_n=128)
    jax.block_until_ready(out)
    ref = _numpy_reference(np.asarray(x), np.asarray(times), np.asarray(labels),
                           num_time, num_label, split)
    _check(out, ref, x, rtol=1e-2, atol=5e-2)          # tolerances sized for bf16 MXU

    # ---- Test 2: D tiled into two 128-lane blocks ("parallel" D axis + per-block
    #      partial stats combined in the wrapper), f32 MXU path, single N step.
    N2, D2 = 300, 256
    T2, L2, split2 = 6, 3, 4
    x2 = jax.random.normal(k2x, (N2, D2), dtype=jnp.float32)
    times2 = jax.random.randint(k2t, (N2,), 0, T2, dtype=jnp.int32)
    labels2 = jax.random.randint(k2l, (N2,), 0, L2, dtype=jnp.int32)

    out2 = jj_norm_forward(x2, times2, labels2, num_time=T2, num_label=L2, split=split2,
                           max_tile_d=128, mxu_dtype=jnp.float32)
    jax.block_until_ready(out2)
    ref2 = _numpy_reference(np.asarray(x2), np.asarray(times2), np.asarray(labels2),
                            T2, L2, split2)
    _check(out2, ref2, x2, rtol=2e-3, atol=2e-3)

    print("KERNEL_OK")
</pallas_src>

<mosaic_0001>
module attributes {stable_mosaic.version = 11 : i64} {
  func.func @jj_norm_kernel(%arg0: i32, %arg1: i32, %arg2: memref<8x128xf32, #tpu.memory_space<vmem>>, %arg3: memref<1x128xi32, #tpu.memory_space<vmem>>, %arg4: memref<128x32xf32, #tpu.memory_space<vmem>>, %arg5: memref<33x32xf32, #tpu.memory_space<vmem>>, %arg6: memref<33x128xf32, #tpu.memory_space<vmem>>, %arg7: memref<8x128xf32, #tpu.memory_space<vmem>>) attributes {dimension_semantics = [#tpu.dimension_semantics<parallel>, #tpu.dimension_semantics<arbitrary>], iteration_bounds = array<i64: 1, 2>, scalar_prefetch = 0 : i64, scratch_operands = 0 : i64, tpu.core_type = #tpu.core_type<tc>, window_params = [{pipeline_mode = #tpu.pipeline_mode<synchronous>, transform_indices = @transform_0, window_bounds = array<i64: 8, 128>}, {transform_indices = @transform_1, window_bounds = array<i64: 1, 128>}, {transform_indices = @transform_2, window_bounds = array<i64: 128, 32>}, {transform_indices = @transform_3, window_bounds = array<i64: 33, 32>}, {transform_indices = @transform_4, window_bounds = array<i64: 33, 128>}, {transform_indices = @transform_5, window_bounds = array<i64: 8, 128>}]} {
    %c0_i32 = arith.constant 0 : i32
    %0 = arith.cmpi eq, %arg1, %c0_i32 : i32
    %1 = arith.extui %0 : i1 to i32
    %c0_i32_0 = arith.constant 0 : i32
    %2 = arith.cmpi ne, %1, %c0_i32_0 : i32
    scf.if %2 {
      %cst_18 = arith.constant 0.000000e+00 : f32
      %34 = vector.broadcast %cst_18 : f32 to vector<33x32xf32>
      %c0_19 = arith.constant 0 : index
      %c0_20 = arith.constant 0 : index
      %35 = vector.load %arg5[%c0_19, %c0_20] : memref<33x32xf32, #tpu.memory_space<vmem>>, vector<33x32xf32>
      tpu.vector_store %arg5[%c0_19, %c0_20], %34 {strides = array<i32>} : memref<33x32xf32, #tpu.memory_space<vmem>>, vector<33x32xf32>,
      %cst_21 = arith.constant 0.000000e+00 : f32
      %36 = vector.broadcast %cst_21 : f32 to vector<33x128xf32>
      %c0_22 = arith.constant 0 : index
      %c0_23 = arith.constant 0 : index
      %37 = vector.load %arg6[%c0_22, %c0_23] : memref<33x128xf32, #tpu.memory_space<vmem>>, vector<33x128xf32>
      tpu.vector_store %arg6[%c0_22, %c0_23], %36 {strides = array<i32>} : memref<33x128xf32, #tpu.memory_space<vmem>>, vector<33x128xf32>,
      %cst_24 = arith.constant 0.000000e+00 : f32
      %38 = vector.broadcast %cst_24 : f32 to vector<8x128xf32>
      %c0_25 = arith.constant 0 : index
      %c0_26 = arith.constant 0 : index
      %39 = vector.load %arg7[%c0_25, %c0_26] : memref<8x128xf32, #tpu.memory_space<vmem>>, vector<8x128xf32>
      tpu.vector_store %arg7[%c0_25, %c0_26], %38 {strides = array<i32>} : memref<8x128xf32, #tpu.memory_space<vmem>>, vector<8x128xf32>,
    } else {
    }
    %c0 = arith.constant 0 : index
    %c0_1 = arith.constant 0 : index
    %3 = vector.load %arg4[%c0, %c0_1] : memref<128x32xf32, #tpu.memory_space<vmem>>, vector<128x32xf32>
    %4 = arith.truncf %3 : vector<128x32xf32> to vector<128x32xbf16>
    %c0_2 = arith.constant 0 : index
    %c0_3 = arith.constant 0 : index
    %5 = vector.load %arg3[%c0_2, %c0_3] : memref<1x128xi32, #tpu.memory_space<vmem>>, vector<1x128xi32>
    %6 = tpu.iota {dimensions = array<i32: 0>} : vector<33x128xi32>
    %7 = vector.broadcast %5 : vector<1x128xi32> to vector<33x128xi32>
    %8 = arith.cmpi eq, %6, %7 : vector<33x128xi32>
    %9 = arith.extui %8 : vector<33x128xi1> to vector<33x128xi32>
    %10 = arith.sitofp %9 : vector<33x128xi32> to vector<33x128xf32>
    %11 = arith.truncf %10 : vector<33x128xf32> to vector<33x128xbf16>
    %12 = arith.mulf %3, %3 : vector<128x32xf32>
    %cst = arith.constant dense<0.000000e+00> : vector<128xf32>
    %13 = vector.multi_reduction <add>, %12, %cst [1] : vector<128x32xf32> to vector<128xf32>
    %14 = vector.shape_cast %13 : vector<128xf32> to vector<128x1xf32>
    %c0_4 = arith.constant 0 : index
    %c0_5 = arith.constant 0 : index
    %15 = vector.load %arg2[%c0_4, %c0_5] : memref<8x128xf32, #tpu.memory_space<vmem>>, vector<1x128xf32>
    %c1 = arith.constant 1 : index
    %c0_6 = arith.constant 0 : index
    %16 = vector.load %arg2[%c1, %c0_6] : memref<8x128xf32, #tpu.memory_space<vmem>>, vector<1x128xf32>
    %17 = vector.broadcast %14 : vector<128x1xf32> to vector<128x128xf32>
    %18 = vector.broadcast %16 : vector<1x128xf32> to vector<128x128xf32>
    %19 = arith.mulf %17, %18 : vector<128x128xf32>
    %20 = vector.broadcast %15 : vector<1x128xf32> to vector<128x128xf32>
    %21 = arith.addf %20, %19 : vector<128x128xf32>
    %22 = arith.truncf %21 : vector<128x128xf32> to vector<128x128xbf16>
    %c0_7 = arith.constant 0 : index
    %c0_8 = arith.constant 0 : index
    %23 = vector.load %arg5[%c0_7, %c0_8] : memref<33x32xf32, #tpu.memory_space<vmem>>, vector<33x32xf32>
    %cst_9 = arith.constant dense<0.000000e+00> : vector<33x32xf32>
    %24 = tpu.matmul %11, %4, %cst_9 {dimension_numbers = #tpu.dot_dimension_numbers<[1], [0], [0], [1], [0, 0, 1, 1], [], []>} : vector<33x128xbf16>, vector<128x32xbf16>, vector<33x32xf32> -> vector<33x32xf32>
    %25 = arith.addf %23, %24 : vector<33x32xf32>
    %c0_10 = arith.constant 0 : index
    %c0_11 = arith.constant 0 : index
    %26 = vector.load %arg5[%c0_10, %c0_11] : memref<33x32xf32, #tpu.memory_space<vmem>>, vector<33x32xf32>
    tpu.vector_store %arg5[%c0_10, %c0_11], %25 {strides = array<i32>} : memref<33x32xf32, #tpu.memory_space<vmem>>, vector<33x32xf32>,
    %c0_12 = arith.constant 0 : index
    %c0_13 = arith.constant 0 : index
    %27 = vector.load %arg6[%c0_12, %c0_13] : memref<33x128xf32, #tpu.memory_space<vmem>>, vector<33x128xf32>
    %cst_14 = arith.constant dense<0.000000e+00> : vector<33x128xf32>
    %28 = tpu.matmul %11, %22, %cst_14 {dimension_numbers = #tpu.dot_dimension_numbers<[1], [0], [0], [1], [0, 0, 1, 1], [], []>} : vector<33x128xbf16>, vector<128x128xbf16>, vector<33x128xf32> -> vector<33x128xf32>
    %29 = arith.addf %27, %28 : vector<33x128xf32>
    %c0_15 = arith.constant 0 : index
    %c0_16 = arith.constant 0 : index
    %30 = vector.load %arg6[%c0_15, %c0_16] : memref<33x128xf32, #tpu.memory_space<vmem>>, vector<33x128xf32>
    tpu.vector_store %arg6[%c0_15, %c0_16], %29 {strides = array<i32>} : memref<33x128xf32, #tpu.memory_space<vmem>>, vector<33x128xf32>,
    %c1_i32 = arith.constant 1 : i32
    %31 = arith.cmpi eq, %arg1, %c1_i32 : i32
    %32 = arith.extui %31 : i1 to i32
    %c0_i32_17 = arith.constant 0 : i32
    %33 = arith.cmpi ne, %32, %c0_i32_17 : i32
    scf.if %33 {
      %c0_18 = arith.constant 0 : index
      %c0_19 = arith.constant 0 : index
      %34 = vector.load %arg5[%c0_18, %c0_19] : memref<33x32xf32, #tpu.memory_space<vmem>>, vector<33x32xf32>
      %c0_20 = arith.constant 0 : index
      %c0_21 = arith.constant 0 : index
      %35 = vector.load %arg6[%c0_20, %c0_21] : memref<33x128xf32, #tpu.memory_space<vmem>>, vector<33x1xf32>
      %c0_22 = arith.constant 0 : index
      %c1_23 = arith.constant 1 : index
      %36 = vector.load %arg6[%c0_22, %c1_23] : memref<33x128xf32, #tpu.memory_space<vmem>>, vector<33x1xf32>
      %37 = arith.mulf %34, %34 : vector<33x32xf32>
      %cst_24 = arith.constant dense<0.000000e+00> : vector<33xf32>
      %38 = vector.multi_reduction <add>, %37, %cst_24 [1] : vector<33x32xf32> to vector<33xf32>
      %39 = vector.shape_cast %38 : vector<33xf32> to vector<33x1xf32>
      %cst_25 = arith.constant 2.000000e+00 : f32
      %40 = vector.broadcast %cst_25 : f32 to vector<33x1xf32>
      %41 = arith.subf %35, %40 : vector<33x1xf32>
      %42 = arith.mulf %41, %39 : vector<33x1xf32>
      %43 = arith.addf %36, %42 : vector<33x1xf32>
      %cst_26 = arith.constant 0.000000e+00 : f32
      %44 = vector.broadcast %cst_26 : f32 to vector<33x1xf32>
      %45 = arith.maximumf %43, %44 : vector<33x1xf32>
      %46 = arith.mulf %35, %39 : vector<33x1xf32>
      %47 = vector.extract_strided_slice %35 {offsets = [32, 0], sizes = [1, 1], strides = [1, 1]} : vector<33x1xf32> to vector<1x1xf32>
      %48 = vector.extract_strided_slice %45 {offsets = [32, 0], sizes = [1, 1], strides = [1, 1]} : vector<33x1xf32> to vector<1x1xf32>
      %49 = tpu.iota {dimensions = array<i32: 0>} : vector<32x128xi32>
      %50 = tpu.iota {dimensions = array<i32: 1>} : vector<32x128xi32>
      %c4_i32 = arith.constant 4 : i32
      %51 = vector.broadcast %c4_i32 : i32 to vector<32x128xi32>
      %52 = arith.muli %50, %51 : vector<32x128xi32>
      %53 = arith.cmpi sge, %49, %52 : vector<32x128xi32>
      %c1_i32_27 = arith.constant 1 : i32
      %54 = vector.broadcast %c1_i32_27 : i32 to vector<32x128xi32>
      %55 = arith.addi %50, %54 : vector<32x128xi32>
      %c4_i32_28 = arith.constant 4 : i32
      %56 = vector.broadcast %c4_i32_28 : i32 to vector<32x128xi32>
      %57 = arith.muli %55, %56 : vector<32x128xi32>
      %58 = arith.cmpi slt, %49, %57 : vector<32x128xi32>
      %59 = arith.andi %53, %58 : vector<32x128xi1>
      %60 = arith.extui %59 : vector<32x128xi1> to vector<32x128xi32>
      %61 = arith.sitofp %60 : vector<32x128xi32> to vector<32x128xf32>
      %62 = vector.extract_strided_slice %35 {offsets = [0, 0], sizes = [32, 1], strides = [1, 1]} : vector<33x1xf32> to vector<32x1xf32>
      %63 = vector.broadcast %62 : vector<32x1xf32> to vector<32x128xf32>
      %64 = arith.mulf %61, %63 : vector<32x128xf32>
      %cst_29 = arith.constant dense<0.000000e+00> : vector<128xf32>
      %65 = vector.multi_reduction <add>, %64, %cst_29 [0] : vector<32x128xf32> to vector<128xf32>
      %66 = vector.shape_cast %65 : vector<128xf32> to vector<1x128xf32>
      %67 = vector.extract_strided_slice %45 {offsets = [0, 0], sizes = [32, 1], strides = [1, 1]} : vector<33x1xf32> to vector<32x1xf32>
      %68 = vector.broadcast %67 : vector<32x1xf32> to vector<32x128xf32>
      %69 = arith.mulf %61, %68 : vector<32x128xf32>
      %cst_30 = arith.constant dense<0.000000e+00> : vector<128xf32>
      %70 = vector.multi_reduction <add>, %69, %cst_30 [0] : vector<32x128xf32> to vector<128xf32>
      %71 = vector.shape_cast %70 : vector<128xf32> to vector<1x128xf32>
      %72 = vector.extract_strided_slice %46 {offsets = [0, 0], sizes = [32, 1], strides = [1, 1]} : vector<33x1xf32> to vector<32x1xf32>
      %73 = vector.broadcast %72 : vector<32x1xf32> to vector<32x128xf32>
      %74 = arith.mulf %61, %73 : vector<32x128xf32>
      %cst_31 = arith.constant dense<0.000000e+00> : vector<128xf32>
      %75 = vector.multi_reduction <add>, %74, %cst_31 [0] : vector<32x128xf32> to vector<128xf32>
      %76 = vector.shape_cast %75 : vector<128xf32> to vector<1x128xf32>
      %77 = tpu.iota {dimensions = array<i32: 1>} : vector<1x128xi32>
      %c0_i32_32 = arith.constant 0 : i32
      %78 = vector.broadcast %c0_i32_32 : i32 to vector<1x128xi32>
      %79 = arith.cmpi eq, %77, %78 : vector<1x128xi32>
      %c1_i32_33 = arith.constant 1 : i32
      %80 = vector.broadcast %c1_i32_33 : i32 to vector<1x128xi32>
      %81 = arith.cmpi eq, %77, %80 : vector<1x128xi32>
      %cst_34 = arith.constant 0.000000e+00 : f32
      %82 = vector.shape_cast %48 : vector<1x1xf32> to vector<1x1xf32>
      %83 = vector.broadcast %82 : vector<1x1xf32> to vector<1x128xf32>
      %84 = vector.broadcast %cst_34 : f32 to vector<1x128xf32>
      %85 = arith.select %81, %83, %84 : vector<1x128xi1>, vector<1x128xf32>
      %86 = vector.shape_cast %47 : vector<1x1xf32> to vector<1x1xf32>
      %87 = vector.broadcast %86 : vector<1x1xf32> to vector<1x128xf32>
      %88 = arith.select %79, %87, %85 : vector<1x128xi1>, vector<1x128xf32>
      %cst_35 = arith.constant 0.000000e+00 : f32
      %89 = vector.broadcast %cst_35 : f32 to vector<4x128xf32>
      %90 = tpu.concatenate %66, %71, %76, %88, %89 in 0 : vector<1x128xf32>, vector<1x128xf32>, vector<1x128xf32>, vector<1x128xf32>, vector<4x128xf32> -> vector<8x128xf32>
      %c0_36 = arith.constant 0 : index
      %c0_37 = arith.constant 0 : index
      %91 = vector.load %arg7[%c0_36, %c0_37] : memref<8x128xf32, #tpu.memory_space<vmem>>, vector<8x128xf32>
      tpu.vector_store %arg7[%c0_36, %c0_37], %90 {strides = array<i32>} : memref<8x128xf32, #tpu.memory_space<vmem>>, vector<8x128xf32>,
    } else {
    }
    return
  }
  func.func @transform_0(%arg0: i32, %arg1: i32) -> (i32, i32) {
    %c0_i32 = arith.constant 0 : i32
    %c0_i32_0 = arith.constant 0 : i32
    %c0_i32_1 = arith.constant 0 : i32
    return %c0_i32, %c0_i32_0 : i32, i32
  }
  func.func @transform_1(%arg0: i32, %arg1: i32) -> (i32, i32) {
    %c0_i32 = arith.constant 0 : i32
    %c0_i32_0 = arith.constant 0 : i32
    return %c0_i32, %arg1 : i32, i32
  }
  func.func @transform_2(%arg0: i32, %arg1: i32) -> (i32, i32) {
    %c0_i32 = arith.constant 0 : i32
    return %arg1, %arg0 : i32, i32
  }
  func.func @transform_3(%arg0: i32, %arg1: i32) -> (i32, i32) {
    %c0_i32 = arith.constant 0 : i32
    %c0_i32_0 = arith.constant 0 : i32
    return %c0_i32, %arg0 : i32, i32
  }
  func.func @transform_4(%arg0: i32, %arg1: i32) -> (i32, i32) {
    %c0_i32 = arith.constant 0 : i32
    %c0_i32_0 = arith.constant 0 : i32
    return %c0_i32, %arg0 : i32, i32
  }
  func.func @transform_5(%arg0: i32, %arg1: i32) -> (i32, i32) {
    %c0_i32 = arith.constant 0 : i32
    %c0_i32_0 = arith.constant 0 : i32
    return %c0_i32, %arg0 : i32, i32
  }
}

</mosaic_0001>

<bundles_post_ra>
// kernel: tpu_custom_call.1
= control target key start
LH: loop header
LB: loop body
LE: loop exit
PB: predicated region body
PF: predicated region fallthrough
CT: control target
= control target key end

     0   :  { %11 = vsyncpa [#allocation3], 0  ;;  %s1427_s0 = inlined_call_operand.vmem [shape: f32[8,128], index: 0, kind: input, shape index: {}]   ;;  %s1428_s1 = inlined_call_operand.vmem [shape: s32[1,256], index: 1, kind: input, shape index: {}]   ;;  %s1429_s2 = inlined_call_operand.vmem [shape: f32[256,32], index: 2, kind: input, shape index: {}]   ;;  %s1430_s3 = inlined_call_operand.vmem [shape: f32[33,32], index: 3, kind: output, shape index: {0}]   ;;  %s1431_s4 = inlined_call_operand.hbm [shape: f32[33,128], index: 4, kind: output, shape index: {1}]   ;;  %s1432_s5 = inlined_call_operand.hbm [shape: f32[8,128], index: 5, kind: output, shape index: {2}]  }
   0x1   :  { %12 = vsyncpa [#allocation5], 0  ;;  %s1125_s18 = smov 0   ;;  %s1127_s19 = smov 0  }
   0x2   :  { %s1129_s20 = smov 0  }
   0x3 LB: > { %s881_s21 = sadd.s32 4294967295, %s1083_s20   ;;  %s27_s22 = sadd.s32 1, %s1079_s19  ;;  %s1083_s20 = sphi %s1129_s20, %s18_s20   ;;  %s1079_s19 = sphi %s1127_s19, %s1441_s19   ;;  %s1075_s18 = sphi %s1125_s18, %s1440_s18  }
   0x4   : > { %p28_p0 = scmp.ge.s32.totalorder %s27_s22, 2  ;;  %p884_p1 = scmp.ge.s32.totalorder %s1083_s20, 1 }
   0x5   : > { %p220_p2 = scmp.lt.s32.totalorder %s1083_s20, 3 }
   0x6   : > { %s1443_s22 = smov (%p28_p0, %s27_s22), 0 }
   0x7   : > { %p221_p3 = pnand %p884_p1, %p220_p2 }
   0x8   : > { %p253_p4 = scmp.lt.s32.totalorder (!%p221_p3), %s1075_s18, 1  ;;  %s885_s23 = sshll.u32 (!%p221_p3), %s1075_s18, 4 }
   0x9   : > { %224 = sbr.rel (%p221_p3) target bundleno = 747 (0x2eb), region = 32  ;;  %p257_p5 = scmp.lt.s32.totalorder (!%p221_p3), %s885_s23, 31 }
   0xa   : > { %p887_p6 = scmp.ne.s32.totalorder (!%p221_p3), %s1075_s18, 0 }
   0xe   : > { %s1149_s24 = scalar_select %p253_p4, %s1075_s18, 1 }
   0xf   : > { %s1445_s23 = smov (!%p257_p5, %s885_s23), 31  ;;  %272 = sbr.rel (%p887_p6) target bundleno = 32 (0x20), region = 36 }
  0x10   : > { %s255_s27 = scalar_lea.vmem %s1428_s1, %s1149_s24  ;;  %s886_s28 = sshll.u32 %s1445_s23, 3 }
  0x11   : > { %s1158_s6 = scalar_lea.vmem %s1429_s2, %s886_s28 }
  0x14   : > { %vm273_vm0 = vcmask 261120   ;;  %v1085_v0 = vmov 0.0   ;;  %vm278_vm1 = vcmask 253952  }
  0x15   : > { %274 = vst.msk [vmem:[%s1430_s3] sm:$0xff] %vm273_vm0, %v1085_v0 }
  0x16   : > { %275 = vst.msk [vmem:[%s1430_s3 + $0x8] sm:$0xff] %vm273_vm0, %v1085_v0 }
  0x17   : > { %276 = vst.msk [vmem:[%s1430_s3 + $0x10] sm:$0xff] %vm273_vm0, %v1085_v0 }
  0x18   : > { %277 = vst.msk [vmem:[%s1430_s3 + $0x18] sm:$0xff] %vm273_vm0, %v1085_v0 }
  0x19   : > { %280 = vst [vmem:[#allocation2] sm:$0xff] %v1085_v0 }
  0x1a   : > { %281 = vst [vmem:[#allocation2 + $0x8] sm:$0xff] %v1085_v0 }
  0x1b   : > { %282 = vst [vmem:[#allocation2 + $0x10] sm:$0xff] %v1085_v0 }
  0x1c   : > { %283 = vst [vmem:[#allocation2 + $0x18] sm:$0xff] %v1085_v0 }
  0x1d   : > { %284 = vst [vmem:[#allocation2 + $0x20] sm:$0x1] %v1085_v0 }
  0x1e   : > { %285 = vst [vmem:[#allocation4] sm:$0xff] %v1085_v0 }
  0x1f   : > { %279 = vst.msk [vmem:[%s1430_s3 + $0x20] sm:$0x1] %vm278_vm1, %v1085_v0 }
  0x20 PF: > { %v1177_v1 = vld [vmem:[%s1158_s6 + $0x70] sm:$0xff]  ;;  %vm352_vm2 = vcmask 261120   ;;  %v1180_v2 = vld [vmem:[%s1158_s6 + $0x60] sm:$0xff]  ;;  %v301_v7 = vld [vmem:[%s1158_s6 + $0x78] sm:$0xff]  ;;  %v311_v60 = vlaneseq  ;;  %vm482_vm11 = vcmask 253952   ;;  %p905_p7 = scmp.ne.s32.totalorder %s1075_s18, 1 }
  0x21   : > { %v1183_v3 = vld [vmem:[%s1158_s6 + $0x50] sm:$0xff]  ;;  %v350_v4 = vmul.f32 %v1177_v1, %v1177_v1  ;;  %v348_v5 = vmul.f32 %v1180_v2, %v1180_v2  ;;  %v299_v8 = vld [vmem:[%s1158_s6 + $0x68] sm:$0xff]  ;;  %v297_v12 = vld [vmem:[%s1158_s6 + $0x58] sm:$0xff]  ;;  %v351_v13 = vmul.f32 %v301_v7, %v301_v7  ;;  %v309_v49 = vpack.c.bf16 %v301_v7, %v1177_v1  ;;  %s1088_s12 = smov (!%p905_p7), 1  }
  0x22   : > { %v346_v6 = vmul.f32 %v1183_v3, %v1183_v3  ;;  %v349_v14 = vmul.f32 %v299_v8, %v299_v8  ;;  %v347_v15 = vmul.f32 %v297_v12, %v297_v12  ;;  %v295_v19 = vld [vmem:[%s1158_s6 + $0x48] sm:$0xff]  ;;  %v294_v20 = vld [vmem:[%s1158_s6 + $0x40] sm:$0xff]  ;;  %v292_v21 = vld [vmem:[%s1158_s6 + $0x30] sm:$0xff]  ;;  %v308_v50 = vpack.c.bf16 %v299_v8, %v1180_v2 }
  0x23   : > { %v395_v9 = vsel %vm352_vm2, %v350_v4, 0.0  ;;  %v389_v10 = vsel %vm352_vm2, %v348_v5, 0.0  ;;  %v398_v16 = vsel %vm352_vm2, %v351_v13, 0.0  ;;  %v345_v22 = vmul.f32 %v295_v19, %v295_v19  ;;  %v293_v28 = vld [vmem:[%s1158_s6 + $0x38] sm:$0xff]  ;;  %v290_v29 = vld [vmem:[%s1158_s6 + $0x20] sm:$0xff]  ;;  %v291_v30 = vld [vmem:[%s1158_s6 + $0x28] sm:$0xff]  ;;  %922 = vmatpush.bf16.msra.mxu2 %v309_v49  ;;  %450 = vmatpush.bf16.msra.mxu0 %v309_v49 }
  0x24   : > { %v383_v11 = vsel %vm352_vm2, %v346_v6, 0.0  ;;  %396 = vadd.xlane.f32.xlu0 %v395_v9  ;;  %390 = vadd.xlane.f32.xlu1 %v389_v10  ;;  %v392_v17 = vsel %vm352_vm2, %v349_v14, 0.0  ;;  %v386_v18 = vsel %vm352_vm2, %v347_v15, 0.0  ;;  %v344_v23 = vmul.f32 %v294_v20, %v294_v20  ;;  %v289_v37 = vld [vmem:[%s1158_s6 + $0x18] sm:$0xff]  ;;  %v288_v38 = vld [vmem:[%s1158_s6 + $0x10] sm:$0xff]  ;;  %v286_v39 = vld [vmem:[%s1158_s6] sm:$0xff] }
  0x25   : > { %384 = vadd.xlane.f32.xlu2 %v383_v11  ;;  %v342_v24 = vmul.f32 %v292_v21, %v292_v21  ;;  %v380_v25 = vsel %vm352_vm2, %v345_v22, 0.0  ;;  %v343_v31 = vmul.f32 %v293_v28, %v293_v28  ;;  %v340_v32 = vmul.f32 %v290_v29, %v290_v29  ;;  %v287_v45 = vld [vmem:[%s1158_s6 + $0x8] sm:$0xff]  ;;  %v1226_v59 = vld [vmem:[%s1427_s0 + $0x1] ss:$0 sm:$0xff]  ;;  %v1234_v63 = vld [vmem:[%s1427_s0] ss:$0 sm:$0xff] }
  0x26   : > { %v377_v26 = vsel %vm352_vm2, %v344_v23, 0.0  ;;  %v341_v33 = vmul.f32 %v291_v30, %v291_v30  ;;  %v339_v40 = vmul.f32 %v289_v37, %v289_v37  ;;  %v338_v41 = vmul.f32 %v288_v38, %v288_v38 }
  0x27   : > { %v371_v27 = vsel %vm352_vm2, %v342_v24, 0.0  ;;  %v374_v34 = vsel %vm352_vm2, %v343_v31, 0.0  ;;  %v365_v35 = vsel %vm352_vm2, %v340_v32, 0.0  ;;  %v336_v42 = vmul.f32 %v286_v39, %v286_v39  ;;  %923 = vmatpush.bf16.msra.mxu2 %v308_v50  ;;  %451 = vmatpush.bf16.msra.mxu0 %v308_v50 }
  0x28   : > { %v368_v36 = vsel %vm352_vm2, %v341_v33, 0.0  ;;  %v362_v43 = vsel %vm352_vm2, %v339_v40, 0.0  ;;  %v359_v44 = vsel %vm352_vm2, %v338_v41, 0.0  ;;  %v337_v47 = vmul.f32 %v287_v45, %v287_v45 }
  0x29   : > { %v353_v46 = vsel %vm352_vm2, %v336_v42, 0.0  ;;  %v307_v51 = vpack.c.bf16 %v297_v12, %v1183_v3  ;;  %v306_v52 = vpack.c.bf16 %v295_v19, %v294_v20  ;;  %v305_v53 = vpack.c.bf16 %v293_v28, %v292_v21  ;;  %v986_v3 = vld [vmem:[%s255_s27] ss:$0 sm:$0xff] }
  0x2a   : > { %v356_v48 = vsel %vm352_vm2, %v337_v47, 0.0  ;;  %v304_v54 = vpack.c.bf16 %v291_v30, %v290_v29  ;;  %v303_v58 = vpack.c.bf16 %v289_v37, %v288_v38  ;;  %v302_v61 = vpack.c.bf16 %v287_v45, %v286_v39 }
  0x2b   : > { %924 = vmatpush.bf16.msra.mxu2 %v307_v51  ;;  %452 = vmatpush.bf16.msra.mxu0 %v307_v51  ;;  %v1229_v62 = vshrl.u32 %v311_v60, 7  ;;  %v1086_v13 = vmov 1.0|1.0  }
  0x2c   : > { %399 = vadd.xlane.f32.xlu0 %v398_v16  ;;  %393 = vadd.xlane.f32.xlu1 %v392_v17 }
  0x2d   : > { %387 = vadd.xlane.f32.xlu2 %v386_v18  ;;  %v1238_v1 = vadd.s32 16, %v1229_v62  ;;  %v1241_v2 = vadd.s32 24, %v1229_v62  ;;  %v1272_v28 = vadd.s32 8, %v1229_v62  ;;  %vm318_vm6 = vcmp.eq.s32.totalorder %v1229_v62, %v986_v3 }
  0x2f   : > { %925 = vmatpush.bf16.msra.mxu2 %v306_v52  ;;  %453 = vmatpush.bf16.msra.mxu0 %v306_v52  ;;  %vm320_vm3 = vcmp.eq.s32.totalorder %v1238_v1, %v986_v3  ;;  %vm321_vm4 = vcmp.eq.s32.totalorder %v1241_v2, %v986_v3  ;;  %vm319_vm7 = vcmp.eq.s32.totalorder %v1272_v28, %v986_v3 }
  0x30   : > { %vm1252_vm5 = vmpackc.low %vm321_vm4, %vm320_vm3 }
  0x31   : > { %vm1279_vm9 = vmpackc.low %vm319_vm7, %vm318_vm6 }
  0x33   : > { %926 = vmatpush.bf16.msra.mxu2 %v305_v53  ;;  %454 = vmatpush.bf16.msra.mxu0 %v305_v53 }
  0x34   : > { %381 = vadd.xlane.f32.xlu1 %v380_v25  ;;  %378 = vadd.xlane.f32.xlu0 %v377_v26 }
  0x35   : > { %372 = vadd.xlane.f32.xlu2 %v371_v27  ;;  %v316_v27 = vadd.s32 32, %v1229_v62 }
  0x37   : > { %927 = vmatpush.bf16.msra.mxu2 %v304_v54  ;;  %455 = vmatpush.bf16.msra.mxu0 %v304_v54  ;;  %vm322_vm8 = vcmp.eq.s32.totalorder %v316_v27, %v986_v3  ;;  %v487_v27 = vld [vmem:[#allocation2 + $0x18] sm:$0xff] }
  0x38   : > { %vm1289_vm10 = vmpackc.low %vm322_vm8, %vm322_vm8 }
  0x3b   : > { %928 = vmatpush.bf16.msra.mxu2 %v303_v58  ;;  %456 = vmatpush.bf16.msra.mxu0 %v303_v58 }
  0x3c   : > { %375 = vadd.xlane.f32.xlu0 %v374_v34  ;;  %366 = vadd.xlane.f32.xlu1 %v365_v35 }
  0x3d   : > { %369 = vadd.xlane.f32.xlu2 %v368_v36 }
  0x3f   : > { %929 = vmatpush.bf16.msra.mxu2 %v302_v61  ;;  %457 = vmatpush.bf16.msra.mxu0 %v302_v61 }
  0x42   : > { %896 = vmatmul.msk.bf16.vlgmr.msra.gmra.mxu2 %vm1252_vm5, %v1086_v13  ;;  %894 = vmatmul.msk.bf16.vlgmr.msra.gmra.mxu0 %vm1279_vm9, %v1086_v13 }
  0x44   : > { %363 = vadd.xlane.f32.xlu1 %v362_v43  ;;  %360 = vadd.xlane.f32.xlu0 %v359_v44 }
  0x45   : > { %354 = vadd.xlane.f32.xlu2 %v353_v46 }
  0x4c   : > { %357 = vadd.xlane.f32.xlu0 %v356_v48 }
  0x52   : > { %898 = vmatmul.msk.bf16.gmra.mxu2 %vm1289_vm10, %v1086_v13 }
  0x97   : > { %v397_v55 = vpop.xlane.xlu0 %396  ;;  %v391_v56 = vpop.xlane.xlu1 %390 }
  0x98   : > { %v385_v57 = vpop.xlane.xlu2 %384  ;;  %v418_v0 = vmul.f32 %v1226_v59, %v397_v55  ;;  %v416_v11 = vmul.f32 %v1226_v59, %v391_v56 }
  0x99   : > { %v414_v14 = vmul.f32 %v1226_v59, %v385_v57 }
  0x9a   : > { %v435_v10 = vadd.f32 %v1234_v63, %v418_v0  ;;  %v433_v18 = vadd.f32 %v1234_v63, %v416_v11  ;;  %v449_v11 = vld [vmem:[%s1430_s3 + $0x20] sm:$0x1] }
  0x9b   : > { %v431_v19 = vadd.f32 %v1234_v63, %v414_v14  ;;  %v446_v14 = vld [vmem:[%s1430_s3 + $0x8] sm:$0xff] }
  0x9f   : > { %v400_v4 = vpop.xlane.xlu0 %399  ;;  %v394_v5 = vpop.xlane.xlu1 %393 }
  0xa0   : > { %v419_v6 = vmul.f32 %v1226_v59, %v400_v4  ;;  %v417_v7 = vmul.f32 %v1226_v59, %v394_v5  ;;  %v388_v8 = vpop.xlane.xlu2 %387  ;;  %v448_v5 = vld [vmem:[%s1430_s3 + $0x18] sm:$0xff] }
  0xa1   : > { %v415_v16 = vmul.f32 %v1226_v59, %v388_v8  ;;  %v445_v8 = vld [vmem:[%s1430_s3] sm:$0xff] }
  0xa2   : > { %v436_v12 = vadd.f32 %v1234_v63, %v419_v6  ;;  %v434_v15 = vadd.f32 %v1234_v63, %v417_v7 }
  0xa3   : > { %v432_v22 = vadd.f32 %v1234_v63, %v415_v16 }
  0xa4   : > { %v444_v17 = vpack.c.bf16 %v436_v12, %v435_v10  ;;  %v443_v25 = vpack.c.bf16 %v434_v15, %v433_v18  ;;  %v484_v18 = vld [vmem:[#allocation2] sm:$0xff] }
  0xa5   : > { %v442_v32 = vpack.c.bf16 %v432_v22, %v431_v19 }
  0xa6   : > { %489 = vmatpush.bf16.msra.mxu1 %v444_v17  ;;  %930 = vmatpush.bf16.msra.mxu3 %v444_v17 }
  0xa7   : > { %v382_v20 = vpop.xlane.xlu1 %381  ;;  %v379_v21 = vpop.xlane.xlu0 %378 }
  0xa8   : > { %v413_v23 = vmul.f32 %v1226_v59, %v382_v20  ;;  %v412_v24 = vmul.f32 %v1226_v59, %v379_v21  ;;  %v373_v26 = vpop.xlane.xlu2 %372  ;;  %v486_v21 = vld [vmem:[#allocation2 + $0x10] sm:$0xff] }
  0xa9   : > { %v410_v31 = vmul.f32 %v1226_v59, %v373_v26 }
  0xaa   : > { %490 = vmatpush.bf16.msra.mxu1 %v443_v25  ;;  %931 = vmatpush.bf16.msra.mxu3 %v443_v25  ;;  %v430_v29 = vadd.f32 %v1234_v63, %v413_v23  ;;  %v429_v30 = vadd.f32 %v1234_v63, %v412_v24  ;;  %v485_v23 = vld [vmem:[#allocation2 + $0x8] sm:$0xff] }
  0xab   : > { %v427_v36 = vadd.f32 %v1234_v63, %v410_v31  ;;  %v488_v31 = vld [vmem:[#allocation2 + $0x20] sm:$0x1] }
  0xac   : > { %v441_v39 = vpack.c.bf16 %v430_v29, %v429_v30 }
  0xae   : > { %491 = vmatpush.bf16.msra.mxu1 %v442_v32  ;;  %932 = vmatpush.bf16.msra.mxu3 %v442_v32 }
  0xaf   : > { %v376_v34 = vpop.xlane.xlu0 %375  ;;  %v367_v35 = vpop.xlane.xlu1 %366 }
  0xb0   : > { %v411_v37 = vmul.f32 %v1226_v59, %v376_v34  ;;  %v408_v38 = vmul.f32 %v1226_v59, %v367_v35  ;;  %v370_v40 = vpop.xlane.xlu2 %369 }
  0xb1   : > { %v409_v42 = vmul.f32 %v1226_v59, %v370_v40 }
  0xb2   : > { %v428_v43 = vadd.f32 %v1234_v63, %v411_v37  ;;  %v425_v44 = vadd.f32 %v1234_v63, %v408_v38  ;;  %492 = vmatpush.bf16.msra.mxu1 %v441_v39  ;;  %933 = vmatpush.bf16.msra.mxu3 %v441_v39 }
  0xb3   : > { %v426_v45 = vadd.f32 %v1234_v63, %v409_v42 }
  0xb4   : > { %v440_v46 = vpack.c.bf16 %v428_v43, %v427_v36 }
  0xb5   : > { %v439_v47 = vpack.c.bf16 %v426_v45, %v425_v44 }
  0xb6   : > { %493 = vmatpush.bf16.msra.mxu1 %v440_v46  ;;  %934 = vmatpush.bf16.msra.mxu3 %v440_v46 }
  0xb7   : > { %v364_v48 = vpop.xlane.xlu1 %363  ;;  %v361_v49 = vpop.xlane.xlu0 %360 }
  0xb8   : > { %v407_v50 = vmul.f32 %v1226_v59, %v364_v48  ;;  %v406_v51 = vmul.f32 %v1226_v59, %v361_v49  ;;  %v355_v52 = vpop.xlane.xlu2 %354 }
  0xb9   : > { %v404_v56 = vmul.f32 %v1226_v59, %v355_v52 }
  0xba   : > { %v424_v53 = vadd.f32 %v1234_v63, %v407_v50  ;;  %v423_v54 = vadd.f32 %v1234_v63, %v406_v51  ;;  %494 = vmatpush.bf16.msra.mxu1 %v439_v47  ;;  %935 = vmatpush.bf16.msra.mxu3 %v439_v47 }
  0xbb   : > { %v421_v61 = vadd.f32 %v1234_v63, %v404_v56 }
  0xbc   : > { %v438_v55 = vpack.c.bf16 %v424_v53, %v423_v54 }
  0xbe   : > { %495 = vmatpush.bf16.msra.mxu1 %v438_v55  ;;  %936 = vmatpush.bf16.msra.mxu3 %v438_v55 }
  0xbf   : > { %v358_v57 = vpop.xlane.xlu0 %357  ;;  %v459_v9 = vpop.f32.mrf.mxu0 }
  0xc0   : > { %v405_v58 = vmul.f32 %v1226_v59, %v358_v57  ;;  %v447_v59 = vld [vmem:[%s1430_s3 + $0x10] sm:$0xff]  ;;  %v473_v10 = vadd.f32 %v459_v9, %v445_v8 }
  0xc2   : > { %v422_v0 = vadd.f32 %v1234_v63, %v405_v58  ;;  %478 = vst.msk [vmem:[%s1430_s3] sm:$0xff] %vm352_vm2, %v473_v10 }
  0xc4   : > { %v437_v3 = vpack.c.bf16 %v422_v0, %v421_v61 }
  0xc5   : > { %v464_v63 = vpop.f32.mrf.mxu2 }
  0xc6   : > { %496 = vmatpush.bf16.msra.mxu1 %v437_v3  ;;  %937 = vmatpush.bf16.msra.mxu3 %v437_v3  ;;  %v475_v4 = vadd.f32 %v464_v63, %v447_v59 }
  0xc7   : > { %v461_v15 = vpop.f32.mrf.mxu0 }
  0xc8   : > { %480 = vst.msk [vmem:[%s1430_s3 + $0x10] sm:$0xff] %vm352_vm2, %v475_v4  ;;  %v474_v16 = vadd.f32 %v461_v15, %v446_v14 }
  0xc9   : > { %902 = vmatmul.msk.bf16.vlgmr.msra.gmra.mxu3 %vm1252_vm5, %v1086_v13  ;;  %900 = vmatmul.msk.bf16.vlgmr.msra.gmra.mxu1 %vm1279_vm9, %v1086_v13 }
  0xca   : > { %479 = vst.msk [vmem:[%s1430_s3 + $0x8] sm:$0xff] %vm352_vm2, %v474_v16 }
  0xcd   : > { %v466_v6 = vpop.f32.mrf.mxu2 }
  0xce   : > { %v476_v7 = vadd.f32 %v466_v6, %v448_v5 }
  0xd0   : > { %481 = vst.msk [vmem:[%s1430_s3 + $0x18] sm:$0xff] %vm352_vm2, %v476_v7 }
  0xd5   : > { %v469_v12 = vpop.f32.mrf.mxu2 }
  0xd9   : > { %904 = vmatmul.msk.bf16.gmra.mxu3 %vm1289_vm10, %v1086_v13  ;;  %v477_v13 = vadd.f32 %v469_v12, %v449_v11 }
  0xdb   : > { %483 = vst.msk [vmem:[%s1430_s3 + $0x20] sm:$0x1] %vm482_vm11, %v477_v13 }
  0xdd   : > { %v471_v17 = vpop.f32.mrf.mxu2 }
 0x146   : > { %v498_v19 = vpop.f32.mrf.mxu1 }
 0x147   : > { %v512_v20 = vadd.f32 %v498_v19, %v484_v18 }
 0x149   : > { %517 = vst [vmem:[#allocation2] sm:$0xff] %v512_v20 }
 0x14c   : > { %v503_v22 = vpop.f32.mrf.mxu3 }
 0x14d   : > { %v514_v24 = vadd.f32 %v503_v22, %v486_v21 }
 0x14e   : > { %v500_v25 = vpop.f32.mrf.mxu1 }
 0x14f   : > { %519 = vst [vmem:[#allocation2 + $0x10] sm:$0xff] %v514_v24  ;;  %v513_v26 = vadd.f32 %v500_v25, %v485_v23 }
 0x151   : > { %518 = vst [vmem:[#allocation2 + $0x8] sm:$0xff] %v513_v26 }
 0x154   : > { %v505_v29 = vpop.f32.mrf.mxu3 }
 0x155   : > { %v515_v30 = vadd.f32 %v505_v29, %v487_v27 }
 0x157   : > { %520 = vst [vmem:[#allocation2 + $0x18] sm:$0xff] %v515_v30 }
 0x15c   : > { %v508_v32 = vpop.f32.mrf.mxu3 }
 0x15d   : > { %v516_v33 = vadd.f32 %v508_v32, %v488_v31 }
 0x15f   : > { %521 = vst [vmem:[#allocation2 + $0x20] sm:$0x1] %v516_v33 }
 0x160   : > { %525 = sbr.rel (%p905_p7) target bundleno = 736 (0x2e0), region = 40 }
 0x164   : > { %v510_v34 = vpop.f32.mrf.mxu3 }
 0x165   : > { %v528_v35 = vld [vmem:[%s1430_s3 + $0x10] sm:$0xff]  ;;  %v526_v36 = vld [vmem:[%s1430_s3] sm:$0xff]  ;;  %v527_v40 = vld [vmem:[%s1430_s3 + $0x8] sm:$0xff]  ;;  %v1087_v50 = vmov 0   ;;  %v1089_v13 = vmov 1   ;;  %v1380_v32 = vand.u32 127, %v311_v60 }
 0x166   : > { %v538_v37 = vmul.f32 %v528_v35, %v528_v35  ;;  %v536_v38 = vmul.f32 %v526_v36, %v526_v36  ;;  %v530_v39 = vld [vmem:[%s1430_s3 + $0x20] sm:$0x1]  ;;  %v529_v42 = vld [vmem:[%s1430_s3 + $0x18] sm:$0xff]  ;;  %v537_v46 = vmul.f32 %v527_v40, %v527_v40  ;;  %988 = vset.pattern.permute.xlu1 %v1087_v50  ;;  %989 = vset.pattern.permute.xlu0 %v1087_v50  ;;  %v533_v51 = vld [vmem:[#allocation2 + $0x10] sm:$0xff]  ;;  %v1090_v40 = vmov 0.0  }
 0x167   : > { %v540_v41 = vmul.f32 %v530_v39, %v530_v39  ;;  %v539_v47 = vmul.f32 %v529_v42, %v529_v42  ;;  %987 = vset.pattern.permute.xlu2 %v1087_v50  ;;  %v531_v52 = vld [vmem:[#allocation2] sm:$0xff]  ;;  %v908_v53 = vadd.f32 -2.0, %v533_v51  ;;  %v532_v61 = vld [vmem:[#allocation2 + $0x8] sm:$0xff]  ;;  %v534_v0 = vld [vmem:[#allocation2 + $0x18] sm:$0xff]  ;;  %v607_v33 = vadd.s32 1, %v1380_v32 }
 0x168   : > { %v547_v43 = vsel %vm352_vm2, %v538_v37, 0.0  ;;  %v541_v44 = vsel %vm352_vm2, %v536_v38, 0.0  ;;  %v544_v48 = vsel %vm352_vm2, %v537_v46, 0.0  ;;  %v906_v54 = vadd.f32 -2.0, %v531_v52  ;;  %v535_v4 = vld [vmem:[#allocation2 + $0x20] sm:$0x1] }
 0x169   : > { %548 = vadd.xlane.f32.xlu1 %v547_v43  ;;  %542 = vadd.xlane.f32.xlu0 %v541_v44  ;;  %v553_v45 = vsel %vm482_vm11, %v540_v41, 0.0  ;;  %v550_v49 = vsel %vm352_vm2, %v539_v47, 0.0  ;;  %v907_v3 = vadd.f32 -2.0, %v532_v61  ;;  %v909_v59 = vadd.f32 -2.0, %v534_v0 }
 0x16a   : > { %554 = vadd.xlane.f32.xlu2 %v553_v45  ;;  %v910_v8 = vadd.f32 -2.0, %v535_v4  ;;  %v602_v36 = vmul.u32 4, %v1380_v32  ;;  %v608_v37 = vmul.u32 4, %v607_v33  ;;  %vm725_vm8 = vcmp.eq.s32.totalorder %v1380_v32, 1 }
 0x16b   : > { %vm724_vm9 = vcmp.eq.s32.totalorder %v1380_v32, 0  ;;  %vm741_vm10 = vcmask 1040384   ;;  %vm743_vm11 = vcmask 1041408  }
 0x16c   : > { %vm604_vm12 = vcmp.ge.s32.totalorder %v1272_v28, %v602_v36  ;;  %vm610_vm13 = vcmp.lt.s32.totalorder %v1272_v28, %v608_v37  ;;  %vm603_vm14 = vcmp.ge.s32.totalorder %v1229_v62, %v602_v36  ;;  %vm609_vm15 = vcmp.lt.s32.totalorder %v1229_v62, %v608_v37 }
 0x16d   : > { %vm614_vm0 = vmand %vm604_vm12, %vm610_vm13  ;;  %vm605_vm1 = vcmp.ge.s32.totalorder %v1238_v1, %v602_v36  ;;  %vm611_vm2 = vcmp.lt.s32.totalorder %v1238_v1, %v608_v37  ;;  %vm606_vm5 = vcmp.ge.s32.totalorder %v1241_v2, %v602_v36  ;;  %vm612_vm6 = vcmp.lt.s32.totalorder %v1241_v2, %v608_v37 }
 0x16e   : > { %vm613_vm3 = vmand %vm603_vm14, %vm609_vm15  ;;  %v912_v41 = vsel %vm614_vm0, 1.0, %v1090_v40  ;;  %vm745_vm12 = vcmask 1042432   ;;  %vm747_vm13 = vcmask 1043456  }
 0x16f   : > { %vm615_vm4 = vmand %vm605_vm1, %vm611_vm2  ;;  %v911_v42 = vsel %vm613_vm3, 1.0, %v1090_v40 }
 0x170   : > { %v913_v44 = vsel %vm615_vm4, 1.0, %v1090_v40  ;;  %vm616_vm7 = vmand %vm606_vm5, %vm612_vm6 }
 0x171   : > { %545 = vadd.xlane.f32.xlu0 %v544_v48  ;;  %551 = vadd.xlane.f32.xlu1 %v550_v49  ;;  %v914_v48 = vsel %vm616_vm7, 1.0, %v1090_v40 }
 0x1dc   : > { %v549_v55 = vpop.xlane.xlu1 %548  ;;  %v543_v56 = vpop.xlane.xlu0 %542 }
 0x1dd   : > { %v563_v57 = vmul.f32 %v908_v53, %v549_v55  ;;  %v561_v58 = vmul.f32 %v906_v54, %v543_v56  ;;  %v555_v9 = vpop.xlane.xlu2 %554  ;;  %v596_v11 = vmul.f32 %v543_v56, %v531_v52  ;;  %v598_v19 = vmul.f32 %v549_v55, %v533_v51 }
 0x1de   : > { %v565_v10 = vmul.f32 %v910_v8, %v555_v9 }
 0x1df   : > { %575 = vrot.lane.b32.xlu1 %v563_v57, %s1088_s12  ;;  %571 = vrot.lane.b32.xlu2 %v561_v58, %s1088_s12 }
 0x1e4   : > { %v546_v63 = vpop.xlane.xlu0 %545  ;;  %v552_v5 = vpop.xlane.xlu1 %551 }
 0x1e5   : > { %v562_v6 = vmul.f32 %v907_v3, %v546_v63  ;;  %v564_v7 = vmul.f32 %v909_v59, %v552_v5  ;;  %v597_v12 = vmul.f32 %v546_v63, %v532_v61  ;;  %v599_v31 = vmul.f32 %v552_v5, %v534_v0 }
 0x1e7   : > { %632 = vperm.xlu1 %988, %v532_v61   ;;  %573 = vrot.lane.b32.xlu0 %v562_v6, %s1088_s12 }
 0x1e8   : > { %577 = vrot.lane.b32.xlu2 %v564_v7, %s1088_s12 }
 0x1ef   : > { %693 = vperm.xlu1 %988, %v596_v11   ;;  %579 = vrot.lane.b32.xlu0 %v565_v10, %s1088_s12 }
 0x1f0   : > { %627 = vperm.xlu2 %987, %v531_v52  }
 0x1f7   : > { %637 = vperm.xlu0 %989, %v533_v51   ;;  %990 = vset.pattern.permute.xlu1 %v1089_v13 }
 0x1f8   : > { %642 = vperm.xlu2 %987, %v534_v0  }
 0x1ff   : > { %698 = vperm.xlu0 %989, %v597_v12  }
 0x200   : > { %992 = vset.pattern.permute.xlu2 %v1089_v13 }
 0x207   : > { %993 = vset.pattern.permute.xlu0 %v1089_v13 }
 0x239   : > { %v572_v14 = vpop.permute.xlu2 %571 }
 0x23a   : > { %v586_v15 = vadd.f32 %v572_v14, %v531_v52 }
 0x23c   : > { %v591_v16 = vmax.f32 %v586_v15, 0.0 }
 0x23e   : > { %660 = vperm.xlu1 %990, %v591_v16  }
 0x242   : > { %v578_v17 = vpop.permute.xlu2 %577 }
 0x243   : > { %v589_v18 = vadd.f32 %v578_v17, %v534_v0 }
 0x245   : > { %v594_v20 = vmax.f32 %v589_v18, 0.0 }
 0x246   : > { %991 = vset.pattern.permute.xlu1 %v1087_v50 }
 0x247   : > { %703 = vperm.xlu1 %991, %v598_v19   ;;  %675 = vperm.xlu0 %993, %v594_v20  }
 0x24a   : > { %v628_v34 = vpop.permute.xlu2 %627 }
 0x24b   : > { %v645_v43 = vmul.f32 %v911_v42, %v628_v34 }
 0x24f   : > { %995 = vset.pattern.permute.xlu1 %v1089_v13  ;;  %996 = vset.pattern.permute.xlu0 %v1087_v50 }
 0x251   : > { %v576_v24 = vpop.permute.xlu1 %575 }
 0x252   : > { %v588_v25 = vadd.f32 %v576_v24, %v533_v51  ;;  %v643_v60 = vpop.permute.xlu2 %642 }
 0x253   : > { %v648_v49 = vmul.f32 %v914_v48, %v643_v60 }
 0x254   : > { %v593_v27 = vmax.f32 %v588_v25, 0.0 }
 0x259   : > { %v574_v21 = vpop.permute.xlu0 %573  ;;  %v633_v35 = vpop.permute.xlu1 %632 }
 0x25a   : > { %v587_v22 = vadd.f32 %v574_v21, %v532_v61  ;;  %v646_v28 = vmul.f32 %v912_v41, %v633_v35 }
 0x25c   : > { %v592_v23 = vmax.f32 %v587_v22, 0.0  ;;  %v649_v47 = vadd.f32 %v646_v28, %v645_v43 }
 0x25e   : > { %665 = vperm.xlu2 %992, %v592_v23  }
 0x261   : > { %v580_v26 = vpop.permute.xlu0 %579  ;;  %v694_v39 = vpop.permute.xlu1 %693 }
 0x262   : > { %v590_v29 = vadd.f32 %v580_v26, %v535_v4  ;;  %v711_v63 = vmul.f32 %v911_v42, %v694_v39 }
 0x264   : > { %v595_v30 = vmax.f32 %v590_v29, 0.0 }
 0x266   : > { %670 = vperm.xlu2 %992, %v593_v27   ;;  %728 = vperm.xlu1 %995, %v595_v30  }
 0x269   : > { %v638_v38 = vpop.permute.xlu0 %637 }
 0x26a   : > { %v647_v46 = vmul.f32 %v913_v44, %v638_v38 }
 0x26e   : > { %994 = vset.pattern.permute.xlu2 %v1087_v50  ;;  %v650_v50 = vadd.f32 %v649_v47, %v647_v46 }
 0x26f   : > { %708 = vperm.xlu2 %994, %v599_v31  }
 0x270   : > { %v651_v55 = vadd.f32 %v650_v50, %v648_v49 }
 0x271   : > { %v699_v62 = vpop.permute.xlu0 %698 }
 0x272   : > { %v712_v0 = vmul.f32 %v912_v41, %v699_v62  ;;  %v652_v3 = vrot.slane %v651_v55, 4 }
 0x274   : > { %v715_v6 = vadd.f32 %v712_v0, %v711_v63  ;;  %v653_v7 = vadd.f32 %v652_v3, %v651_v55 }
 0x276   : > { %v654_v14 = vrot.slane %v653_v7, 2 }
 0x277   : > { %734 = vperm.xlu2 %994, %v535_v4  }
 0x278   : > { %v655_v18 = vadd.f32 %v654_v14, %v653_v7 }
 0x27a   : > { %v656_v22 = vrot.slane %v655_v18, 1 }
 0x27c   : > { %v657_v27 = vadd.f32 %v656_v22, %v655_v18 }
 0x2b0   : > { %v661_v1 = vpop.permute.xlu1 %660 }
 0x2b1   : > { %v678_v53 = vmul.f32 %v911_v42, %v661_v1 }
 0x2b8   : > { %v666_v45 = vpop.permute.xlu2 %665 }
 0x2b9   : > { %v679_v51 = vmul.f32 %v912_v41, %v666_v45  ;;  %v676_v52 = vpop.permute.xlu0 %675  ;;  %v704_v58 = vpop.permute.xlu1 %703 }
 0x2ba   : > { %v681_v2 = vmul.f32 %v914_v48, %v676_v52  ;;  %v713_v4 = vmul.f32 %v913_v44, %v704_v58 }
 0x2bb   : > { %v682_v56 = vadd.f32 %v679_v51, %v678_v53 }
 0x2bc   : > { %v716_v10 = vadd.f32 %v715_v6, %v713_v4 }
 0x2c0   : > { %v671_v54 = vpop.permute.xlu2 %670 }
 0x2c1   : > { %v680_v57 = vmul.f32 %v913_v44, %v671_v54 }
 0x2c3   : > { %v683_v61 = vadd.f32 %v682_v56, %v680_v57 }
 0x2c5   : > { %v684_v59 = vadd.f32 %v683_v61, %v681_v2 }
 0x2c7   : > { %v685_v5 = vrot.slane %v684_v59, 4 }
 0x2c9   : > { %v686_v8 = vadd.f32 %v685_v5, %v684_v59  ;;  %v709_v9 = vpop.permute.xlu2 %708 }
 0x2ca   : > { %v714_v11 = vmul.f32 %v914_v48, %v709_v9 }
 0x2cb   : > { %v687_v12 = vrot.slane %v686_v8, 2 }
 0x2cc   : > { %v717_v13 = vadd.f32 %v716_v10, %v714_v11 }
 0x2cd   : > { %v688_v16 = vadd.f32 %v687_v12, %v686_v8 }
 0x2ce   : > { %v718_v15 = vrot.slane %v717_v13, 4 }
 0x2cf   : > { %v689_v20 = vrot.slane %v688_v16, 1 }
 0x2d0   : > { %v719_v17 = vadd.f32 %v718_v15, %v717_v13 }
 0x2d1   : > { %v690_v24 = vadd.f32 %v689_v20, %v688_v16  ;;  %v735_v29 = vpop.permute.xlu2 %734 }
 0x2d2   : > { %v720_v19 = vrot.slane %v719_v17, 2 }
 0x2d3   : > { %v742_v34 = vsel %vm741_vm10, %v657_v27, %v690_v24 }
 0x2d4   : > { %v721_v21 = vadd.f32 %v720_v19, %v719_v17 }
 0x2d6   : > { %v722_v23 = vrot.slane %v721_v21, 1 }
 0x2d8   : > { %v723_v25 = vadd.f32 %v722_v23, %v721_v21  ;;  %v729_v26 = vpop.permute.xlu1 %728 }
 0x2d9   : > { %v731_v30 = vsel %vm725_vm8, %v729_v26, 0.0 }
 0x2da   : > { %v737_v31 = vsel %vm724_vm9, %v735_v29, %v731_v30  ;;  %v744_v35 = vsel %vm743_vm11, %v742_v34, %v723_v25 }
 0x2db   : > { %v739_v33 = vrot.slane %v737_v31, 5 }
 0x2dd   : > { %v746_v36 = vsel %vm745_vm12, %v744_v35, %v739_v33 }
 0x2de   : > { %v748_v37 = vsel %vm747_vm13, %v746_v36, 0.0 }
 0x2df   : > { %749 = vst [vmem:[#allocation4] sm:$0xff] %v748_v37 }
 0x2e0 PF: > { %p1396_p8 = scmp.eq.s32.totalorder %s881_s21, 1  ;;  %s766_s16 = sshll.u32 %s1431_s4, 4  ;;  %s767_s16 = int_to_ptr.hbm [resolvable:$true] %s766_s16 }
 0x2e1   : > { %s1091_s17 = smov [#allocation2]   ;;  %s1092_s25 = smov 128  }
 0x2e2   : > { %s764_s23 = sshll.u32 %s1091_s17, 4  ;;  %s1093_s26 = smov 8   ;;  %s765_s23 = int_to_ptr.vmem [resolvable:$true] %s764_s23 }
 0x2e3   : > { %939 = dma.vmem_to_hbm [thread:$0]  (%p1396_p8), %s765_s23, 640, %s767_s16, [#allocation3], %s1092_s25, %s1092_s25, %s1093_s26  }
 0x2e4   : > { %s1094_s28 = smov [#allocation4]   ;;  %s783_s27 = sshll.u32 %s1432_s5, 4  ;;  %s784_s27 = int_to_ptr.hbm [resolvable:$true] %s783_s27 }
 0x2e5   : > { %s781_s21 = sshll.u32 %s1094_s28, 4  ;;  %s782_s21 = int_to_ptr.vmem [resolvable:$true] %s781_s21 }
 0x2e6   : > { %941 = dma.vmem_to_hbm [thread:$0]  (%p1396_p8), %s782_s21, 128, %s784_s27, [#allocation5]  }
 0x2e7   : > { %1066 = dma.done.wait (%p1396_p8), [#allocation3], 640  }
 0x2e8   : > { %1068 = vsyncadd (%p1396_p8), [#allocation3], 4294966656 }
 0x2e9   : > { %1070 = dma.done.wait (%p1396_p8), [#allocation5], 128  }
 0x2ea   : > { %1072 = vsyncadd (%p1396_p8), [#allocation5], 4294967168 }
 0x2eb PF: > { %s18_s20 = sadd.s32 1, %s1083_s20   ;;  %s1440_s18 = smov %s1079_s19 }
 0x2ec   : > { %p15_p9 = scmp.ge.s32.totalorder %s18_s20, 4   ;;  %s1441_s19 = smov %s1443_s22 }
 0x2ee   :  { %17 = sbr.rel (!%p15_p9) target bundleno = 3 (0x3), region = 92 }
 0x2f3   :  { %809 = vsyncpa [#allocation3], 1 }
 0x2f4   :  { %811 = vsyncpa [#allocation3 + $0x1], 1 }
 0x2f5   :  { %812 = vsyncpa [#allocation5], 1 }

</bundles_post_ra>
